<compile_context>
chip_gen: v7x
topology: tpu7x:2x2x1
jax: 0.10.0
libtpu: 0.0.40
codegen_flags: <defaults>
</compile_context>

<pallas_src>
import functools
import math

import jax
import jax.numpy as jnp
from jax.experimental import pallas as pl
from jax.experimental.pallas import tpu as pltpu


LANE = 128
ACT_DTYPE = jnp.bfloat16   # HBM-resident activation dtype (MXU operands)

# Rows of the flattened (H*W, C) matmul targeted per conv grid step.  Kept
# small here so the 16x16 demo actually exercises multi-step grids and the
# manual DMA prefetch path; for production image sizes raise to ~512-1024
# (v6e, 128 MiB VMEM) or ~256-512 (v7x, 64 MiB VMEM).
TILE_M_TARGET = 128


def _cpad(c):
    return ((c + LANE - 1) // LANE) * LANE


def _pick_tile(n, target):
    """Largest t <= target dividing n with t % 8 == 0 (or t == n)."""
    if n <= target:
        return n
    for t in range(target, 0, -1):
        if n % t == 0 and t % 8 == 0:
            return t
    return n


def _pick_row_tile(h, w, target_rows, need_pool):
    """Rows of H per conv grid step: divides h, sublane-friendly, pool-friendly."""
    want = max(1, target_rows // max(w, 1))
    for th in range(min(want, h), 0, -1):
        if h % th:
            continue
        if (th * w) % 8 != 0 and th != h:
            continue
        if need_pool:
            if th % 2:
                continue
            mp = (th // 2) * (w // 2)
            if mp % 8 != 0 and th != h:
                continue
        return th
    return h


def _vmem_spec():
    return pl.BlockSpec(memory_space=pltpu.MemorySpace.VMEM)


# ---------------------------------------------------------------------------
# Pallas kernels
# ---------------------------------------------------------------------------
def normalize_kernel(x_ref, mean_ref, inv_std_ref, o_ref):
    # (img - mean) / std, per channel (channels = lane dim)
    o_ref[...] = ((x_ref[...] - mean_ref[...]) * inv_std_ref[...]).astype(o_ref.dtype)


def conv_gram_kernel(w_ref, b_ref, x_hbm, *rest, tile_h, out_w, apply_relu,
                     gram_scale, emit_full, emit_pool):
    """One row-tile of a 3x3/stride-1 conv (+bias, +fused input ReLU), with a
    running gram-matrix accumulation in the grid-resident gram output block,
    optional full-resolution output and optional fused 2x2 max-pooled output.

    x_hbm : (H+2, W+2, Cin) zero-padded input left in HBM (pl.ANY); row tiles
            (tile_h + 2 halo rows) are manually DMA'd, double-buffered.
    w_ref : (9, Cin, Cout) bf16 taps, VMEM-resident across the grid.
    outputs (in order, flags static): [full (tile_h*W, Cout) bf16]
            [pooled (tile_h/2*W/2, Cout) bf16] gram (Cout, Cout) f32 accum.
    """
    n_out = 1 + int(emit_full) + int(emit_pool)
    outs = rest[:n_out]
    xbuf, sem = rest[n_out], rest[n_out + 1]
    k = 0
    full_ref = None
    pool_ref = None
    if emit_full:
        full_ref = outs[k]
        k += 1
    if emit_pool:
        pool_ref = outs[k]
        k += 1
    gram_ref = outs[k]

    i = pl.program_id(0)
    nsteps = pl.num_programs(0)
    slot = i % 2

    def start_fetch(step, buf_slot):
        pltpu.make_async_copy(
            x_hbm.at[pl.ds(step * tile_h, tile_h + 2)],
            xbuf.at[buf_slot],
            sem.at[buf_slot],
        ).start()

    @pl.when(i == 0)
    def _():
        start_fetch(0, 0)
        gram_ref[...] = jnp.zeros_like(gram_ref)

    # Wait for the current tile (dummy src slice; only dst/sem matter).
    pltpu.make_async_copy(
        x_hbm.at[pl.ds(0, tile_h + 2)], xbuf.at[slot], sem.at[slot]
    ).wait()

    # Prefetch the next row tile while computing on this one.
    @pl.when(i + 1 < nsteps)
    def _():
        start_fetch(i + 1, (i + 1) % 2)

    x = xbuf[slot]                                  # (tile_h+2, W+2, Cin)
    if apply_relu:
        # ReLU of the previous feature map; relu(0)=0 so it commutes with the
        # zero padding, and it is applied once per block (not per tap).
        x = jnp.maximum(x, 0.0)
    x = x.astype(jnp.bfloat16)

    cin = x.shape[-1]
    cout = gram_ref.shape[-1]
    m = tile_h * out_w

    acc = jnp.zeros((m, cout), jnp.float32)
    for dy in range(3):                             # 9 shifted-window taps
        for dx in range(3):
            win = x[dy:dy + tile_h, dx:dx + out_w, :].reshape(m, cin)
            acc = acc + jnp.dot(win, w_ref[dy * 3 + dx],
                                preferred_element_type=jnp.float32)
    y = acc + b_ref[...]                            # (m, cout) f32

    if emit_full:
        full_ref[...] = y.astype(full_ref.dtype)

    if emit_pool:
        # Fused 2x2/stride-2 max-pool of this row tile (tile_h, out_w even).
        # Pool/ReLU commute, so the consumer conv still applies ReLU.
        hp = jnp.max(y.reshape(m // 2, 2, cout), axis=1)           # horiz pairs
        vp = jnp.max(hp.reshape(tile_h // 2, 2, out_w // 2, cout), axis=1)
        pool_ref[...] = vp.reshape((tile_h // 2) * (out_w // 2),
                                   cout).astype(pool_ref.dtype)

    # Fused gram epilogue: G += Y^T Y for this row tile.
    yb = y.astype(jnp.bfloat16)
    gram_ref[...] += jax.lax.dot_general(
        yb, yb, (((0,), (0,)), ((), ())), preferred_element_type=jnp.float32)

    @pl.when(i == nsteps - 1)
    def _():
        gram_ref[...] = gram_ref[...] * gram_scale


def style_mse_kernel(*refs, inv_counts):
    # refs = (g0, t0, g1, t1, ..., g4, t4, out).  Grams are channel-padded
    # with exact zeros on both sides, so summing squared diffs over the padded
    # matrix and dividing by the TRUE element count matches F.mse_loss.
    out_ref = refs[-1]
    total = jnp.zeros((1, 1), jnp.float32)
    for k, inv in enumerate(inv_counts):
        d = refs[2 * k][...] - refs[2 * k + 1][...]
        total = total + jnp.sum(d * d, keepdims=True) * inv
    out_ref[...] = total


def content_mse_kernel(a_ref, b_ref, o_ref, acc_ref, *, inv_n):
    i = pl.program_id(0)

    @pl.when(i == 0)
    def _():
        acc_ref[...] = jnp.zeros_like(acc_ref)

    d = a_ref[...].astype(jnp.float32) - b_ref[...].astype(jnp.float32)
    acc_ref[...] += jnp.sum(d * d, keepdims=True)

    @pl.when(i == pl.num_programs(0) - 1)
    def _():
        o_ref[...] = acc_ref[...] * inv_n


# ---------------------------------------------------------------------------
# Pallas wrappers
# ---------------------------------------------------------------------------
def pallas_normalize(x2d, mean, inv_std):
    n, c = x2d.shape
    tile = _pick_tile(n, 2048)
    return pl.pallas_call(
        normalize_kernel,
        out_shape=jax.ShapeDtypeStruct((n, c), jnp.float32),
        grid_spec=pltpu.PrefetchScalarGridSpec(
            num_scalar_prefetch=0,
            grid=(n // tile,),
            in_specs=[
                pl.BlockSpec((tile, c), lambda i: (i, 0)),
                pl.BlockSpec((1, c), lambda i: (0, 0)),
                pl.BlockSpec((1, c), lambda i: (0, 0)),
            ],
            out_specs=pl.BlockSpec((tile, c), lambda i: (i, 0)),
        ),
        compiler_params=pltpu.CompilerParams(
            dimension_semantics=("parallel",)),
    )(x2d, mean, inv_std)


@functools.lru_cache(maxsize=None)
def _conv_gram_call(h, w, cin, cout, cout_true, apply_relu, emit_full,
                    emit_pool, in_dtype):
    tile_h = _pick_row_tile(h, w, TILE_M_TARGET, emit_pool)
    nsteps = h // tile_h
    m = tile_h * w
    gram_scale = 1.0 / float(cout_true * h * w)

    kern = functools.partial(conv_gram_kernel, tile_h=tile_h, out_w=w,
                             apply_relu=apply_relu, gram_scale=gram_scale,
                             emit_full=emit_full, emit_pool=emit_pool)

    out_shapes = []
    out_specs = []
    if emit_full:
        out_shapes.append(jax.ShapeDtypeStruct((h * w, cout), ACT_DTYPE))
        out_specs.append(pl.BlockSpec((m, cout), lambda i: (i, 0)))
    if emit_pool:
        mp = (tile_h // 2) * (w // 2)
        out_shapes.append(
            jax.ShapeDtypeStruct(((h // 2) * (w // 2), cout), ACT_DTYPE))
        out_specs.append(pl.BlockSpec((mp, cout), lambda i: (i, 0)))
    out_shapes.append(jax.ShapeDtypeStruct((cout, cout), jnp.float32))
    out_specs.append(pl.BlockSpec((cout, cout), lambda i: (0, 0)))  # accumulator

    in_itemsize = in_dtype.itemsize
    flops = 2 * h * w * (9 * cin * cout + cout * cout)
    bytes_accessed = ((h + 2) * (w + 2) * cin * in_itemsize
                      + 9 * cin * cout * 2
                      + (h * w * cout * 2 if emit_full else 0)
                      + ((h // 2) * (w // 2) * cout * 2 if emit_pool else 0)
                      + cout * cout * 4 + cout * 4)

    return pl.pallas_call(
        kern,
        out_shape=tuple(out_shapes),
        grid_spec=pltpu.PrefetchScalarGridSpec(
            num_scalar_prefetch=0,
            grid=(nsteps,),
            in_specs=[
                pl.BlockSpec((9, cin, cout), lambda i: (0, 0, 0)),  # resident
                pl.BlockSpec((1, cout), lambda i: (0, 0)),          # resident
                pl.BlockSpec(memory_space=pl.ANY),                  # manual DMA
            ],
            out_specs=tuple(out_specs),
            scratch_shapes=[
                pltpu.VMEM((2, tile_h + 2, w + 2, cin), in_dtype),
                pltpu.SemaphoreType.DMA((2,)),
            ],
        ),
        # Row axis carries the gram reduction -> sequential ("arbitrary").
        compiler_params=pltpu.CompilerParams(
            dimension_semantics=("arbitrary",)),
        cost_estimate=pl.CostEstimate(flops=int(flops), transcendentals=0,
                                      bytes_accessed=int(bytes_accessed)),
    )


def conv3x3_gram(xp, w9, b, *, out_hw, cout_true, apply_relu, emit_full,
                 emit_pool):
    h, w = out_hw
    cin = xp.shape[-1]
    cout = w9.shape[-1]
    call = _conv_gram_call(h, w, cin, cout, cout_true, bool(apply_relu),
                           bool(emit_full), bool(emit_pool), xp.dtype)
    return call(w9, b, xp)


def pallas_style_mse(grams, targets, true_channels):
    inv_counts = tuple(1.0 / float(c * c) for c in true_channels)
    args, specs = [], []
    for g, t in zip(grams, targets):
        args += [g, t]
        specs += [_vmem_spec(), _vmem_spec()]
    out = pl.pallas_call(
        functools.partial(style_mse_kernel, inv_counts=inv_counts),
        out_shape=jax.ShapeDtypeStruct((1, 1), jnp.float32),
        in_specs=specs,
        out_specs=_vmem_spec(),
    )(*args)
    return out[0, 0]


def pallas_content_mse(a, b, n_true):
    n, c = a.shape
    tile = _pick_tile(n, 1024)
    out = pl.pallas_call(
        functools.partial(content_mse_kernel, inv_n=1.0 / float(n_true)),
        out_shape=jax.ShapeDtypeStruct((1, 1), jnp.float32),
        grid_spec=pltpu.PrefetchScalarGridSpec(
            num_scalar_prefetch=0,
            grid=(n // tile,),
            in_specs=[pl.BlockSpec((tile, c), lambda i: (i, 0)),
                      pl.BlockSpec((tile, c), lambda i: (i, 0))],
            out_specs=pl.BlockSpec((1, 1), lambda i: (0, 0)),
            scratch_shapes=[pltpu.VMEM((1, 1), jnp.float32)],
        ),
        compiler_params=pltpu.CompilerParams(
            dimension_semantics=("arbitrary",)),
    )(a, b)
    return out[0, 0]


# ---------------------------------------------------------------------------
# Model configuration / parameters / glue (layout & data movement only)
# ---------------------------------------------------------------------------
# VGG19 first-5-conv grouping produced by the PyTorch Model.__init__:
#   layer1: conv(3->64)
#   layer2: relu, conv(64->64)
#   layer3: relu, pool, conv(64->128)
#   layer4: relu, conv(128->128)
#   layer5: relu, pool, conv(128->256)
# The relu at the start of a layer is fused into that layer's conv kernel;
# the pool at the start of layers 3/5 is fused into the PREVIOUS conv's
# epilogue (relu and max-pool commute).
VGG_CFG = [
    # (cin_true, cout_true, relu_on_input)
    (3, 64, False),
    (64, 64, True),
    (64, 128, True),
    (128, 128, True),
    (128, 256, True),
]
# Full-resolution output needed downstream (next conv input / content loss)?
EMIT_FULL = (True, False, True, True, False)
# Does the NEXT layer start with a 2x2 max-pool (fused here)?
EMIT_POOL = (False, True, False, True, False)

MEAN = jnp.array([[0.485, 0.456, 0.406]], jnp.float32)
INV_STD = 1.0 / jnp.array([[0.229, 0.224, 0.225]], jnp.float32)


def make_params(key):
    """Deterministic synthetic VGG-shaped weights, zero-padded to 128 lanes.

    Returns per layer (w: (9, cin_pad, cout_pad) bf16, b: (1, cout_pad) f32).
    Padded weight rows/cols and bias entries are zero, so padded output
    channels are exactly zero and do not change any loss value.
    """
    params = []
    for li, (cin, cout, _) in enumerate(VGG_CFG):
        key, kw, kb = jax.random.split(key, 3)
        w = jax.random.normal(kw, (3, 3, cin, cout), jnp.float32) * (
            1.0 / math.sqrt(9.0 * cin))
        b = jax.random.normal(kb, (1, cout), jnp.float32) * 0.01
        cin_p = cin if li == 0 else _cpad(cin)      # image stays 3-channel
        cout_p = _cpad(cout)
        wp = jnp.zeros((3, 3, cin_p, cout_p), jnp.float32)
        wp = wp.at[:, :, :cin, :cout].set(w)
        bp = jnp.zeros((1, cout_p), jnp.float32).at[:, :cout].set(b)
        params.append((wp.reshape(9, cin_p, cout_p).astype(jnp.bfloat16), bp))
    return params


def run_layers(img_nchw, params):
    """Normalize + 5 conv blocks (gram + pool fused into the conv kernels).

    Returns (layer-4 full feature map (H/2*W/2, 128) bf16,
             list of 5 channel-padded gram matrices, f32)."""
    x = jnp.transpose(img_nchw[0], (1, 2, 0))       # NCHW (batch=1) -> HWC
    h, w, c = x.shape
    x = pallas_normalize(x.reshape(h * w, c), MEAN, INV_STD).reshape(h, w, c)

    grams = []
    feat4 = None
    for li, ((cin, cout, relu), (w9, b)) in enumerate(zip(VGG_CFG, params)):
        hc, wc, _ = x.shape
        # TODO(synk): fold the zero-padding into the conv kernel's manual DMA.
        xp = jnp.pad(x, ((1, 1), (1, 1), (0, 0)))   # conv's zero padding
        outs = conv3x3_gram(xp, w9, b, out_hw=(hc, wc), cout_true=cout,
                            apply_relu=relu, emit_full=EMIT_FULL[li],
                            emit_pool=EMIT_POOL[li])
        k = 0
        full = pooled = None
        if EMIT_FULL[li]:
            full = outs[k]
            k += 1
        if EMIT_POOL[li]:
            pooled = outs[k]
            k += 1
        gram = outs[k]
        grams.append(gram)
        if li == 3:
            feat4 = full                            # layer-4 conv output
        cpad = w9.shape[-1]
        if EMIT_POOL[li]:
            x = pooled.reshape(hc // 2, wc // 2, cpad)
        elif EMIT_FULL[li]:
            x = full.reshape(hc, wc, cpad)
        else:
            x = None                                # last layer: gram only
    return feat4, grams


def forward(input_img, params, target_s, target_c4):
    """Matches Model.forward: returns (style_loss, content_loss)."""
    feat4, grams = run_layers(input_img, params)
    style_loss = pallas_style_mse(grams, target_s,
                                  [cfg[1] for cfg in VGG_CFG])
    # TODO(synk): the content MSE could be fused into the layer-4 conv epilogue.
    content_loss = pallas_content_mse(feat4, target_c4,
                                      feat4.shape[0] * VGG_CFG[3][1])
    return style_loss, content_loss


if __name__ == "__main__":
    key = jax.random.PRNGKey(0)
    kp, kc, ks, ki = jax.random.split(key, 4)

    params = make_params(kp)

    H = W = 16
    content_img = jax.random.uniform(kc, (1, 3, H, W), jnp.float32)
    style_img = jax.random.uniform(ks, (1, 3, H, W), jnp.float32)
    input_img = jax.random.uniform(ki, (1, 3, H, W), jnp.float32)

    # "__init__" phase: content / style targets via the same kernels.
    target_c4, _ = run_layers(content_img, params)
    _, target_s = run_layers(style_img, params)

    style_loss, content_loss = forward(input_img, params, target_s, target_c4)
    jax.block_until_ready((style_loss, content_loss))
    print("KERNEL_OK")
</pallas_src>

<mosaic_0001>
module attributes {stable_mosaic.version = 11 : i64} {
  func.func @normalize_kernel(%arg0: i32, %arg1: memref<256x3xf32, #tpu.memory_space<vmem>>, %arg2: memref<1x3xf32, #tpu.memory_space<vmem>>, %arg3: memref<1x3xf32, #tpu.memory_space<vmem>>, %arg4: memref<256x3xf32, #tpu.memory_space<vmem>>) attributes {dimension_semantics = [#tpu.dimension_semantics<parallel>], iteration_bounds = array<i64: 1>, scalar_prefetch = 0 : i64, scratch_operands = 0 : i64, tpu.core_type = #tpu.core_type<tc>, window_params = [{transform_indices = @transform_0, window_bounds = array<i64: 256, 3>}, {pipeline_mode = #tpu.pipeline_mode<synchronous>, transform_indices = @transform_1, window_bounds = array<i64: 1, 3>}, {pipeline_mode = #tpu.pipeline_mode<synchronous>, transform_indices = @transform_2, window_bounds = array<i64: 1, 3>}, {transform_indices = @transform_3, window_bounds = array<i64: 256, 3>}]} {
    %c0 = arith.constant 0 : index
    %c0_0 = arith.constant 0 : index
    %0 = vector.load %arg1[%c0, %c0_0] : memref<256x3xf32, #tpu.memory_space<vmem>>, vector<256x3xf32>
    %c0_1 = arith.constant 0 : index
    %c0_2 = arith.constant 0 : index
    %1 = vector.load %arg2[%c0_1, %c0_2] : memref<1x3xf32, #tpu.memory_space<vmem>>, vector<1x3xf32>
    %2 = vector.broadcast %1 : vector<1x3xf32> to vector<256x3xf32>
    %3 = arith.subf %0, %2 : vector<256x3xf32>
    %c0_3 = arith.constant 0 : index
    %c0_4 = arith.constant 0 : index
    %4 = vector.load %arg3[%c0_3, %c0_4] : memref<1x3xf32, #tpu.memory_space<vmem>>, vector<1x3xf32>
    %5 = vector.broadcast %4 : vector<1x3xf32> to vector<256x3xf32>
    %6 = arith.mulf %3, %5 : vector<256x3xf32>
    %c0_5 = arith.constant 0 : index
    %c0_6 = arith.constant 0 : index
    %7 = vector.load %arg4[%c0_5, %c0_6] : memref<256x3xf32, #tpu.memory_space<vmem>>, vector<256x3xf32>
    tpu.vector_store %arg4[%c0_5, %c0_6], %6 {strides = array<i32>} : memref<256x3xf32, #tpu.memory_space<vmem>>, vector<256x3xf32>,
    return
  }
  func.func @transform_0(%arg0: i32) -> (i32, i32) {
    %c0_i32 = arith.constant 0 : i32
    %c0_i32_0 = arith.constant 0 : i32
    return %arg0, %c0_i32 : i32, i32
  }
  func.func @transform_1(%arg0: i32) -> (i32, i32) {
    %c0_i32 = arith.constant 0 : i32
    %c0_i32_0 = arith.constant 0 : i32
    %c0_i32_1 = arith.constant 0 : i32
    return %c0_i32, %c0_i32_0 : i32, i32
  }
  func.func @transform_2(%arg0: i32) -> (i32, i32) {
    %c0_i32 = arith.constant 0 : i32
    %c0_i32_0 = arith.constant 0 : i32
    %c0_i32_1 = arith.constant 0 : i32
    return %c0_i32, %c0_i32_0 : i32, i32
  }
  func.func @transform_3(%arg0: i32) -> (i32, i32) {
    %c0_i32 = arith.constant 0 : i32
    %c0_i32_0 = arith.constant 0 : i32
    return %arg0, %c0_i32 : i32, i32
  }
}

</mosaic_0001>

<bundles_post_ra>
// kernel: tpu_custom_call.1
= control target key start
LH: loop header
LB: loop body
LE: loop exit
PB: predicated region body
PF: predicated region fallthrough
CT: control target
= control target key end

     0   :  { %vm124_vm0 = vcmask 23552   ;;  %s481_s0 = inlined_call_operand.vmem [shape: f32[256,3], index: 0, kind: input, shape index: {}]   ;;  %s482_s1 = inlined_call_operand.vmem [shape: f32[1,3], index: 1, kind: input, shape index: {}]   ;;  %s483_s2 = inlined_call_operand.vmem [shape: f32[1,3], index: 2, kind: input, shape index: {}]   ;;  %s484_s3 = inlined_call_operand.vmem [shape: f32[256,3], index: 3, kind: output, shape index: {}]  }
   0x1   :  { %v14_v0 = vld [vmem:[%s481_s0] sm:$0xff]  ;;  %v15_v4 = vld [vmem:[%s481_s0 + $0x8] sm:$0xff]  ;;  %v16_v5 = vld [vmem:[%s481_s0 + $0x10] sm:$0xff] }
   0x2   :  { %v189_v1 = vld [vmem:[%s482_s1] ss:$0 sm:$0xff]  ;;  %v17_v6 = vld [vmem:[%s481_s0 + $0x18] sm:$0xff]  ;;  %v19_v11 = vld [vmem:[%s481_s0 + $0x28] sm:$0xff] }
   0x3   :  { %v194_v2 = vld [vmem:[%s483_s2] ss:$0 sm:$0xff]  ;;  %v53_v3 = vsub.f32 %v14_v0, %v189_v1  ;;  %v54_v7 = vsub.f32 %v15_v4, %v189_v1  ;;  %v55_v8 = vsub.f32 %v16_v5, %v189_v1  ;;  %v56_v9 = vsub.f32 %v17_v6, %v189_v1  ;;  %v20_v12 = vld [vmem:[%s481_s0 + $0x30] sm:$0xff]  ;;  %v21_v17 = vld [vmem:[%s481_s0 + $0x38] sm:$0xff] }
   0x4   :  { %v18_v10 = vld [vmem:[%s481_s0 + $0x20] sm:$0xff]  ;;  %v58_v15 = vsub.f32 %v19_v11, %v189_v1  ;;  %v59_v16 = vsub.f32 %v20_v12, %v189_v1  ;;  %v23_v19 = vld [vmem:[%s481_s0 + $0x48] sm:$0xff]  ;;  %v60_v23 = vsub.f32 %v21_v17, %v189_v1  ;;  %v24_v24 = vld [vmem:[%s481_s0 + $0x50] sm:$0xff] }
   0x5   :  { %v92_v13 = vmul.f32 %v194_v2, %v53_v3  ;;  %v57_v14 = vsub.f32 %v18_v10, %v189_v1  ;;  %v22_v18 = vld [vmem:[%s481_s0 + $0x40] sm:$0xff]  ;;  %v93_v20 = vmul.f32 %v194_v2, %v54_v7  ;;  %v94_v21 = vmul.f32 %v194_v2, %v55_v8  ;;  %v25_v25 = vld [vmem:[%s481_s0 + $0x58] sm:$0xff]  ;;  %v27_v31 = vld [vmem:[%s481_s0 + $0x68] sm:$0xff] }
   0x6   :  { %v95_v22 = vmul.f32 %v194_v2, %v56_v9  ;;  %v26_v26 = vld [vmem:[%s481_s0 + $0x60] sm:$0xff]  ;;  %v97_v28 = vmul.f32 %v194_v2, %v58_v15  ;;  %v98_v29 = vmul.f32 %v194_v2, %v59_v16  ;;  %v61_v30 = vsub.f32 %v22_v18, %v189_v1  ;;  %v28_v32 = vld [vmem:[%s481_s0 + $0x70] sm:$0xff]  ;;  %v29_v33 = vld [vmem:[%s481_s0 + $0x78] sm:$0xff] }
   0x7   :  { %125 = vst.msk [vmem:[%s484_s3] sm:$0xff] %vm124_vm0, %v92_v13  ;;  %v96_v27 = vmul.f32 %v194_v2, %v57_v14  ;;  %126 = vst.msk [vmem:[%s484_s3 + $0x8] sm:$0xff] %vm124_vm0, %v93_v20  ;;  %v99_v34 = vmul.f32 %v194_v2, %v60_v23  ;;  %v62_v35 = vsub.f32 %v23_v19, %v189_v1  ;;  %v30_v38 = vld [vmem:[%s481_s0 + $0x80] sm:$0xff]  ;;  %v31_v43 = vld [vmem:[%s481_s0 + $0x88] sm:$0xff] }
   0x8   :  { %127 = vst.msk [vmem:[%s484_s3 + $0x10] sm:$0xff] %vm124_vm0, %v94_v21  ;;  %128 = vst.msk [vmem:[%s484_s3 + $0x18] sm:$0xff] %vm124_vm0, %v95_v22  ;;  %v63_v36 = vsub.f32 %v24_v24, %v189_v1  ;;  %v64_v37 = vsub.f32 %v25_v25, %v189_v1  ;;  %v100_v39 = vmul.f32 %v194_v2, %v61_v30  ;;  %v32_v44 = vld [vmem:[%s481_s0 + $0x90] sm:$0xff]  ;;  %v33_v45 = vld [vmem:[%s481_s0 + $0x98] sm:$0xff] }
   0x9   :  { %129 = vst.msk [vmem:[%s484_s3 + $0x20] sm:$0xff] %vm124_vm0, %v96_v27  ;;  %130 = vst.msk [vmem:[%s484_s3 + $0x28] sm:$0xff] %vm124_vm0, %v97_v28  ;;  %v65_v40 = vsub.f32 %v26_v26, %v189_v1  ;;  %v66_v41 = vsub.f32 %v27_v31, %v189_v1  ;;  %v67_v42 = vsub.f32 %v28_v32, %v189_v1  ;;  %v34_v50 = vld [vmem:[%s481_s0 + $0xa0] sm:$0xff]  ;;  %v35_v51 = vld [vmem:[%s481_s0 + $0xa8] sm:$0xff] }
   0xa   :  { %131 = vst.msk [vmem:[%s484_s3 + $0x30] sm:$0xff] %vm124_vm0, %v98_v29  ;;  %132 = vst.msk [vmem:[%s484_s3 + $0x38] sm:$0xff] %vm124_vm0, %v99_v34  ;;  %v101_v46 = vmul.f32 %v194_v2, %v62_v35  ;;  %v102_v47 = vmul.f32 %v194_v2, %v63_v36  ;;  %v103_v48 = vmul.f32 %v194_v2, %v64_v37  ;;  %v36_v52 = vld [vmem:[%s481_s0 + $0xb0] sm:$0xff]  ;;  %v37_v57 = vld [vmem:[%s481_s0 + $0xb8] sm:$0xff] }
   0xb   :  { %v68_v49 = vsub.f32 %v29_v33, %v189_v1  ;;  %133 = vst.msk [vmem:[%s484_s3 + $0x40] sm:$0xff] %vm124_vm0, %v100_v39  ;;  %v104_v53 = vmul.f32 %v194_v2, %v65_v40  ;;  %v105_v54 = vmul.f32 %v194_v2, %v66_v41  ;;  %v106_v55 = vmul.f32 %v194_v2, %v67_v42  ;;  %v38_v62 = vld [vmem:[%s481_s0 + $0xc0] sm:$0xff]  ;;  %v39_v5 = vld [vmem:[%s481_s0 + $0xc8] sm:$0xff]  ;;  %v40_v6 = vld [vmem:[%s481_s0 + $0xd0] sm:$0xff] }
   0xc   :  { %v69_v56 = vsub.f32 %v30_v38, %v189_v1  ;;  %134 = vst.msk [vmem:[%s484_s3 + $0x48] sm:$0xff] %vm124_vm0, %v101_v46  ;;  %135 = vst.msk [vmem:[%s484_s3 + $0x50] sm:$0xff] %vm124_vm0, %v102_v47  ;;  %v70_v59 = vsub.f32 %v31_v43, %v189_v1  ;;  %v71_v60 = vsub.f32 %v32_v44, %v189_v1  ;;  %v41_v7 = vld [vmem:[%s481_s0 + $0xd8] sm:$0xff]  ;;  %v42_v12 = vld [vmem:[%s481_s0 + $0xe0] sm:$0xff] }
   0xd   :  { %136 = vst.msk [vmem:[%s484_s3 + $0x58] sm:$0xff] %vm124_vm0, %v103_v48  ;;  %v107_v58 = vmul.f32 %v194_v2, %v68_v49  ;;  %v72_v61 = vsub.f32 %v33_v45, %v189_v1  ;;  %137 = vst.msk [vmem:[%s484_s3 + $0x60] sm:$0xff] %vm124_vm0, %v104_v53  ;;  %v73_v0 = vsub.f32 %v34_v50, %v189_v1  ;;  %v43_v13 = vld [vmem:[%s481_s0 + $0xe8] sm:$0xff]  ;;  %v44_v14 = vld [vmem:[%s481_s0 + $0xf0] sm:$0xff] }
   0xe   :  { %138 = vst.msk [vmem:[%s484_s3 + $0x68] sm:$0xff] %vm124_vm0, %v105_v54  ;;  %139 = vst.msk [vmem:[%s484_s3 + $0x70] sm:$0xff] %vm124_vm0, %v106_v55  ;;  %v108_v63 = vmul.f32 %v194_v2, %v69_v56  ;;  %v74_v3 = vsub.f32 %v35_v51, %v189_v1  ;;  %v75_v4 = vsub.f32 %v36_v52, %v189_v1  ;;  %v45_v19 = vld [vmem:[%s481_s0 + $0xf8] sm:$0xff] }
   0xf   :  { %140 = vst.msk [vmem:[%s484_s3 + $0x78] sm:$0xff] %vm124_vm0, %v107_v58  ;;  %v109_v8 = vmul.f32 %v194_v2, %v70_v59  ;;  %v110_v9 = vmul.f32 %v194_v2, %v71_v60  ;;  %v111_v10 = vmul.f32 %v194_v2, %v72_v61  ;;  %v76_v11 = vsub.f32 %v37_v57, %v189_v1 }
  0x10   :  { %141 = vst.msk [vmem:[%s484_s3 + $0x80] sm:$0xff] %vm124_vm0, %v108_v63  ;;  %v112_v15 = vmul.f32 %v194_v2, %v73_v0  ;;  %v113_v16 = vmul.f32 %v194_v2, %v74_v3  ;;  %v114_v17 = vmul.f32 %v194_v2, %v75_v4  ;;  %v77_v18 = vsub.f32 %v38_v62, %v189_v1 }
  0x11   :  { %142 = vst.msk [vmem:[%s484_s3 + $0x88] sm:$0xff] %vm124_vm0, %v109_v8  ;;  %143 = vst.msk [vmem:[%s484_s3 + $0x90] sm:$0xff] %vm124_vm0, %v110_v9  ;;  %v115_v20 = vmul.f32 %v194_v2, %v76_v11  ;;  %v78_v21 = vsub.f32 %v39_v5, %v189_v1  ;;  %v79_v22 = vsub.f32 %v40_v6, %v189_v1 }
  0x12   :  { %144 = vst.msk [vmem:[%s484_s3 + $0x98] sm:$0xff] %vm124_vm0, %v111_v10  ;;  %v80_v23 = vsub.f32 %v41_v7, %v189_v1  ;;  %145 = vst.msk [vmem:[%s484_s3 + $0xa0] sm:$0xff] %vm124_vm0, %v112_v15  ;;  %v116_v24 = vmul.f32 %v194_v2, %v77_v18  ;;  %v81_v25 = vsub.f32 %v42_v12, %v189_v1 }
  0x13   :  { %146 = vst.msk [vmem:[%s484_s3 + $0xa8] sm:$0xff] %vm124_vm0, %v113_v16  ;;  %147 = vst.msk [vmem:[%s484_s3 + $0xb0] sm:$0xff] %vm124_vm0, %v114_v17  ;;  %v82_v26 = vsub.f32 %v43_v13, %v189_v1  ;;  %v83_v27 = vsub.f32 %v44_v14, %v189_v1  ;;  %v117_v28 = vmul.f32 %v194_v2, %v78_v21 }
  0x14   :  { %148 = vst.msk [vmem:[%s484_s3 + $0xb8] sm:$0xff] %vm124_vm0, %v115_v20  ;;  %v118_v29 = vmul.f32 %v194_v2, %v79_v22  ;;  %v119_v30 = vmul.f32 %v194_v2, %v80_v23  ;;  %v84_v31 = vsub.f32 %v45_v19, %v189_v1  ;;  %149 = vst.msk [vmem:[%s484_s3 + $0xc0] sm:$0xff] %vm124_vm0, %v116_v24 }
  0x15   :  { %v120_v32 = vmul.f32 %v194_v2, %v81_v25  ;;  %v121_v33 = vmul.f32 %v194_v2, %v82_v26  ;;  %v122_v34 = vmul.f32 %v194_v2, %v83_v27  ;;  %150 = vst.msk [vmem:[%s484_s3 + $0xc8] sm:$0xff] %vm124_vm0, %v117_v28 }
  0x16   :  { %151 = vst.msk [vmem:[%s484_s3 + $0xd0] sm:$0xff] %vm124_vm0, %v118_v29  ;;  %152 = vst.msk [vmem:[%s484_s3 + $0xd8] sm:$0xff] %vm124_vm0, %v119_v30  ;;  %v123_v1 = vmul.f32 %v194_v2, %v84_v31 }
  0x17   :  { %153 = vst.msk [vmem:[%s484_s3 + $0xe0] sm:$0xff] %vm124_vm0, %v120_v32  ;;  %154 = vst.msk [vmem:[%s484_s3 + $0xe8] sm:$0xff] %vm124_vm0, %v121_v33 }
  0x18   :  { %155 = vst.msk [vmem:[%s484_s3 + $0xf0] sm:$0xff] %vm124_vm0, %v122_v34  ;;  %156 = vst.msk [vmem:[%s484_s3 + $0xf8] sm:$0xff] %vm124_vm0, %v123_v1 }

</bundles_post_ra>
